<compile_context>
chip_gen: v5e
topology: v5e:2x2
jax: 0.10.0
libtpu: 0.0.40
codegen_flags: <defaults>
</compile_context>

<pallas_src>
import functools

import jax
import jax.numpy as jnp
from jax.experimental import pallas as pl
from jax.experimental.pallas import tpu as pltpu

_LANES = 128
_SUBLANES = 8


def _detect_num_tensorcores():
    """Best-effort: 2 on dual-TensorCore chips (v7x), else 1."""
    try:
        dev = jax.devices()[0]
        for attr in ("num_cores", "core_count", "num_tensorcores"):
            v = getattr(dev, attr, None)
            if isinstance(v, int) and v >= 1:
                return min(int(v), 2)
    except Exception:
        pass
    return 1


def _xla_sse(a, b):
    d = a.astype(jnp.float32) - b.astype(jnp.float32)
    return jnp.sum(d * d)


def _sse_kernel(x_ref, y_ref, o_ref, acc_ref, *, block_rows, steps,
                valid_rows, needs_mask):
    """Per split (outer axis): fold (x-y)^2 into an (8,128) accumulator per
    block; one tiny cross-lane reduce + SMEM store at the last inner step.

    INVARIANT: while rows % block_rows != 0 or phantom steps exist, the
    boundary/phantom mask below must stay — Pallas edge padding / re-DMA'd
    clamped blocks hold garbage that the mask zeroes out.
    """
    t = pl.program_id(1)

    @pl.when(t == 0)
    def _init():
        acc_ref[...] = jnp.zeros_like(acc_ref)   # (8,128): a single vreg

    d = x_ref[...].astype(jnp.float32) - y_ref[...].astype(jnp.float32)
    sq = d * d

    def _accumulate(vals):
        # (block_rows,128) -> (block_rows//8, 8, 128): tile-aligned reshape
        # (free), then a leading-dim fold -> (8,128): pure vreg adds.
        acc_ref[...] += vals.reshape(
            block_rows // _SUBLANES, _SUBLANES, _LANES).sum(axis=0)

    if needs_mask:
        s = pl.program_id(0)
        g = s * steps + t                          # unclamped global block
        row0 = g * block_rows
        boundary = row0 + block_rows > valid_rows  # ragged / phantom block

        @pl.when(jnp.logical_not(boundary))
        def _hot():                                # interior block: no mask
            _accumulate(sq)

        @pl.when(boundary)
        def _cold():                               # boundary / phantom block
            row_ids = row0 + jax.lax.broadcasted_iota(
                jnp.int32, (block_rows, 1), 0)
            _accumulate(jnp.where(row_ids < valid_rows, sq, 0.0))
    else:
        _accumulate(sq)

    @pl.when(t == steps - 1)
    def _finish():
        o_ref[0, 0] = jnp.sum(acc_ref[...])


def denoising_loss(x, y, epsilon, *, block_rows=8192, num_splits=None,
                   min_pallas_elems=1 << 20):
    """Pallas equivalent of DenoisingNetwork.forward: sum((x-y)^2)/(2*eps)."""
    assert x.shape == y.shape, "x and y must have the same shape"
    n = x.size
    inv_scale = jnp.float32(1.0 / (2.0 * float(epsilon)))

    if n == 0:
        return jnp.float32(0.0)

    # Tiny tensors: launch + pipeline prologue dominate; let XLA fuse it.
    if n < min_pallas_elems:
        return _xla_sse(x, y) * inv_scale

    xf = jnp.ravel(x)
    yf = jnp.ravel(y)

    rows = n // _LANES            # complete 128-lane rows
    rem = n - rows * _LANES       # ragged tail, < 128 elements

    if rows < _SUBLANES:
        # Too small for one (8,128)-aligned block; XLA handles it.
        return _xla_sse(x, y) * inv_scale

    tail = jnp.float32(0.0)
    if rem:
        # <128-element remainder via a tiny fused XLA sum (no full-array pad).
        main = rows * _LANES
        tail = _xla_sse(xf[main:], yf[main:])
        xf = xf[:main]
        yf = yf[:main]

    x2 = xf.reshape(rows, _LANES)  # free bitcast when no tail slice was taken
    y2 = yf.reshape(rows, _LANES)

    # Block rows: multiple of 8, no larger than the biggest 8-aligned prefix.
    max_block = rows - rows % _SUBLANES
    block_rows = max(_SUBLANES, min(int(block_rows), max_block))
    block_rows -= block_rows % _SUBLANES

    total_blocks = -(-rows // block_rows)
    if num_splits is None:
        num_splits = _detect_num_tensorcores()
    num_splits = max(1, min(int(num_splits), total_blocks))
    steps = -(-total_blocks // num_splits)
    # Mask needed only for a ragged boundary block and/or phantom steps of
    # the last split; both are cold pl.when paths in the kernel.
    needs_mask = (rows % block_rows != 0) or (num_splits * steps != total_blocks)

    # int32 row-index guard (row0 = g * block_rows computed in int32).
    assert rows + (num_splits + 1) * block_rows < 2 ** 31, "rows overflow int32"

    def data_index(s, t):
        g = s * steps + t
        if needs_mask:
            g = jnp.minimum(g, total_blocks - 1)  # keep phantom-step DMA in bounds
        return (g, 0)

    kernel = functools.partial(
        _sse_kernel, block_rows=block_rows, steps=steps,
        valid_rows=rows, needs_mask=needs_mask)

    # VMEM budget: 2 inputs x 2 pipeline buffers + a few f32 block-sized
    # intermediates + headroom; capped under v7x's 64 MiB physical per-TC.
    block_bytes = block_rows * _LANES * x2.dtype.itemsize
    vmem_limit = 4 * block_bytes + 3 * block_rows * _LANES * 4 + (4 << 20)
    vmem_limit = int(max(16 << 20, min(vmem_limit, 60 << 20)))

    partials = pl.pallas_call(
        kernel,
        out_shape=jax.ShapeDtypeStruct((num_splits, 1), jnp.float32),
        grid_spec=pltpu.PrefetchScalarGridSpec(
            num_scalar_prefetch=0,
            grid=(num_splits, steps),
            in_specs=[
                pl.BlockSpec((block_rows, _LANES), data_index),
                pl.BlockSpec((block_rows, _LANES), data_index),
            ],
            out_specs=pl.BlockSpec((1, 1), lambda s, t: (s, 0),
                                   memory_space=pltpu.SMEM),
            scratch_shapes=[pltpu.VMEM((_SUBLANES, _LANES), jnp.float32)],
        ),
        compiler_params=pltpu.CompilerParams(
            # Outer split axis can be sharded across TensorCores; inner axis
            # carries the accumulator -> arbitrary.
            dimension_semantics=("parallel", "arbitrary"),
            vmem_limit_bytes=vmem_limit,
        ),
        cost_estimate=pl.CostEstimate(
            flops=3 * x2.size,
            transcendentals=0,
            bytes_accessed=x2.nbytes + y2.nbytes + num_splits * 4),
    )(x2, y2)

    return (jnp.sum(partials) + tail) * inv_scale


if __name__ == "__main__":
    epsilon = 0.5

    def ref_loss(a, b):
        d = a.astype(jnp.float32) - b.astype(jnp.float32)
        return jnp.sum(d * d) / (2.0 * epsilon)

    key = jax.random.PRNGKey(0)

    # Primary small NCHW case (what the module expects), forced through Pallas.
    kx, ky = jax.random.split(key)
    x = jax.random.normal(kx, (2, 4, 16, 16), dtype=jnp.float32)
    y = jax.random.normal(ky, (2, 4, 16, 16), dtype=jnp.float32)
    out = jax.block_until_ready(denoising_loss(x, y, epsilon, min_pallas_elems=0))
    ref = ref_loss(x, y)
    assert jnp.allclose(out, ref, rtol=1e-5, atol=1e-5), (out, ref)

    # Multi-block + 2-split path: exercises boundary mask + phantom steps.
    kx, ky, key = jax.random.split(key, 3)
    xs = jax.random.normal(kx, (2, 4, 513, 128), dtype=jnp.float32)
    ys = jax.random.normal(ky, (2, 4, 513, 128), dtype=jnp.float32)
    o = jax.block_until_ready(denoising_loss(xs, ys, epsilon, min_pallas_elems=0,
                                             block_rows=512, num_splits=2))
    r = ref_loss(xs, ys)
    assert jnp.allclose(o, r, rtol=1e-4, atol=1e-3), (o, r)

    # Ragged shape (numel % 128 != 0): Pallas prefix + tiny XLA tail, no pad.
    kx, ky, key = jax.random.split(key, 3)
    xr = jax.random.normal(kx, (3, 5, 7, 11), dtype=jnp.float32)
    yr = jax.random.normal(ky, (3, 5, 7, 11), dtype=jnp.float32)
    o = jax.block_until_ready(denoising_loss(xr, yr, epsilon, min_pallas_elems=0))
    r = ref_loss(xr, yr)
    assert jnp.allclose(o, r, rtol=1e-4, atol=1e-3), (o, r)

    # Default big-block streaming path on a larger tensor (1M elements).
    kx, ky, key = jax.random.split(key, 3)
    xb = jax.random.normal(kx, (4, 8, 128, 256), dtype=jnp.float32)
    yb = jax.random.normal(ky, (4, 8, 128, 256), dtype=jnp.float32)
    o = jax.block_until_ready(denoising_loss(xb, yb, epsilon))
    r = ref_loss(xb, yb)
    assert jnp.allclose(o, r, rtol=1e-4, atol=1e-2), (o, r)

    print("KERNEL_OK")
</pallas_src>

<mosaic_0001>
module attributes {stable_mosaic.version = 11 : i64} {
  func.func @_sse_kernel(%arg0: i32, %arg1: i32, %arg2: memref<16x128xf32, #tpu.memory_space<vmem>>, %arg3: memref<16x128xf32, #tpu.memory_space<vmem>>, %arg4: memref<1x1xf32, #tpu.memory_space<smem>>, %arg5: memref<8x128xf32, #tpu.memory_space<vmem>>) attributes {dimension_semantics = [#tpu.dimension_semantics<parallel>, #tpu.dimension_semantics<arbitrary>], iteration_bounds = array<i64: 1, 1>, scalar_prefetch = 0 : i64, scratch_operands = 1 : i64, tpu.core_type = #tpu.core_type<tc>, window_params = [{transform_indices = @transform_0, window_bounds = array<i64: 16, 128>}, {transform_indices = @transform_1, window_bounds = array<i64: 16, 128>}, {transform_indices = @transform_2, window_bounds = array<i64: 1, 1>}]} {
    %c0_i32 = arith.constant 0 : i32
    %0 = arith.cmpi eq, %arg1, %c0_i32 : i32
    %1 = arith.extui %0 : i1 to i32
    %c0_i32_0 = arith.constant 0 : i32
    %2 = arith.cmpi ne, %1, %c0_i32_0 : i32
    scf.if %2 {
      %cst_10 = arith.constant 0.000000e+00 : f32
      %15 = vector.broadcast %cst_10 : f32 to vector<8x128xf32>
      %c0_11 = arith.constant 0 : index
      %c0_12 = arith.constant 0 : index
      %16 = vector.load %arg5[%c0_11, %c0_12] : memref<8x128xf32, #tpu.memory_space<vmem>>, vector<8x128xf32>
      tpu.vector_store %arg5[%c0_11, %c0_12], %15 {strides = array<i32>} : memref<8x128xf32, #tpu.memory_space<vmem>>, vector<8x128xf32>,
    } else {
    }
    %c0 = arith.constant 0 : index
    %c0_1 = arith.constant 0 : index
    %3 = vector.load %arg2[%c0, %c0_1] : memref<16x128xf32, #tpu.memory_space<vmem>>, vector<16x128xf32>
    %c0_2 = arith.constant 0 : index
    %c0_3 = arith.constant 0 : index
    %4 = vector.load %arg3[%c0_2, %c0_3] : memref<16x128xf32, #tpu.memory_space<vmem>>, vector<16x128xf32>
    %5 = arith.subf %3, %4 : vector<16x128xf32>
    %6 = arith.mulf %5, %5 : vector<16x128xf32>
    %c0_4 = arith.constant 0 : index
    %c0_5 = arith.constant 0 : index
    %7 = vector.load %arg5[%c0_4, %c0_5] : memref<8x128xf32, #tpu.memory_space<vmem>>, vector<8x128xf32>
    %8 = vector.shape_cast %6 : vector<16x128xf32> to vector<2x8x128xf32>
    %cst = arith.constant dense<0.000000e+00> : vector<8x128xf32>
    %9 = vector.multi_reduction <add>, %8, %cst [0] : vector<2x8x128xf32> to vector<8x128xf32>
    %10 = arith.addf %7, %9 : vector<8x128xf32>
    %c0_6 = arith.constant 0 : index
    %c0_7 = arith.constant 0 : index
    %11 = vector.load %arg5[%c0_6, %c0_7] : memref<8x128xf32, #tpu.memory_space<vmem>>, vector<8x128xf32>
    tpu.vector_store %arg5[%c0_6, %c0_7], %10 {strides = array<i32>} : memref<8x128xf32, #tpu.memory_space<vmem>>, vector<8x128xf32>,
    %c0_i32_8 = arith.constant 0 : i32
    %12 = arith.cmpi eq, %arg1, %c0_i32_8 : i32
    %13 = arith.extui %12 : i1 to i32
    %c0_i32_9 = arith.constant 0 : i32
    %14 = arith.cmpi ne, %13, %c0_i32_9 : i32
    scf.if %14 {
      %c0_10 = arith.constant 0 : index
      %c0_11 = arith.constant 0 : index
      %15 = vector.load %arg5[%c0_10, %c0_11] : memref<8x128xf32, #tpu.memory_space<vmem>>, vector<8x128xf32>
      %16 = vector.shape_cast %15 : vector<8x128xf32> to vector<1x8x128xf32>
      %cst_12 = arith.constant dense<0.000000e+00> : vector<1xf32>
      %17 = vector.multi_reduction <add>, %16, %cst_12 [1, 2] : vector<1x8x128xf32> to vector<1xf32>
      %18 = vector.shape_cast %17 : vector<1xf32> to vector<1x1x1xf32>
      %19 = vector.extract %18[0, 0, 0] : f32 from vector<1x1x1xf32>
      %c0_13 = arith.constant 0 : index
      %c0_14 = arith.constant 0 : index
      %20 = memref.load %arg4[%c0_13, %c0_14] : memref<1x1xf32, #tpu.memory_space<smem>>
      memref.store %19, %arg4[%c0_13, %c0_14] : memref<1x1xf32, #tpu.memory_space<smem>>
    } else {
    }
    return
  }
  func.func @transform_0(%arg0: i32, %arg1: i32) -> (i32, i32) {
    %c1_i32 = arith.constant 1 : i32
    %0 = arith.muli %arg0, %c1_i32 : i32
    %1 = arith.addi %0, %arg1 : i32
    %c0_i32 = arith.constant 0 : i32
    %c0_i32_0 = arith.constant 0 : i32
    return %1, %c0_i32 : i32, i32
  }
  func.func @transform_1(%arg0: i32, %arg1: i32) -> (i32, i32) {
    %c1_i32 = arith.constant 1 : i32
    %0 = arith.muli %arg0, %c1_i32 : i32
    %1 = arith.addi %0, %arg1 : i32
    %c0_i32 = arith.constant 0 : i32
    %c0_i32_0 = arith.constant 0 : i32
    return %1, %c0_i32 : i32, i32
  }
  func.func @transform_2(%arg0: i32, %arg1: i32) -> (i32, i32) {
    %c0_i32 = arith.constant 0 : i32
    %c0_i32_0 = arith.constant 0 : i32
    return %arg0, %c0_i32 : i32, i32
  }
}

</mosaic_0001>

<bundles_post_ra>
// kernel: tpu_custom_call.1
= control target key start
LH: loop header
LB: loop body
LE: loop exit
PB: predicated region body
PF: predicated region fallthrough
CT: control target
= control target key end

     0   :  { %7 = vsyncpa [#allocation4], 0  ;;  %s207_s0 = inlined_call_operand.hbm [shape: f32[16,128], index: 0, kind: input, shape index: {}]   ;;  %s208_s1 = inlined_call_operand.hbm [shape: f32[16,128], index: 1, kind: input, shape index: {}]   ;;  %s209_s2 = inlined_call_operand.hbm [shape: f32[1,1], index: 2, kind: output, shape index: {}]  }
   0x1   :  { %8 = vsyncpa [#allocation7], 0 }
   0x2   :  { %9 = vsyncpa [#allocation5], 0  ;;  %s18_s11 = sshll.u32 %s207_s0, 4  ;;  %s178_s12 = smov [#allocation3]   ;;  %s19_s11 = int_to_ptr.hbm [resolvable:$true] %s18_s11 }
   0x3   :  { %s20_s13 = sshll.u32 %s178_s12, 4  ;;  %s35_s16 = sshll.u32 %s208_s1, 4  ;;  %s21_s13 = int_to_ptr.vmem [resolvable:$true] %s20_s13  ;;  %s36_s16 = int_to_ptr.hbm [resolvable:$true] %s35_s16 }
   0x4   :  { %s179_s17 = smov 128   ;;  %s180_s18 = smov 8  }
   0x5   :  { %26 = dma.hbm_to_vmem [thread:$0]  %s19_s11, 256, %s21_s13, [#allocation4], %s179_s17, %s179_s17, %s180_s18  }
   0x6   :  { %s181_s19 = smov [#allocation6]  }
   0x7   :  { %s37_s20 = sshll.u32 %s181_s19, 4  ;;  %s38_s20 = int_to_ptr.vmem [resolvable:$true] %s37_s20 }
   0x8   :  { %43 = dma.hbm_to_vmem [thread:$0]  %s36_s16, 256, %s38_s20, [#allocation7], %s179_s17, %s179_s17, %s180_s18  }
   0x9   :  { %172 = dma.done.wait [#allocation4], 256  }
   0xa   :  { %173 = vsyncadd [#allocation4], 4294967040 }
   0xb   :  { %174 = dma.done.wait [#allocation7], 256  }
   0xc   :  { %175 = vsyncadd [#allocation7], 4294967040  ;;  %v61_v0 = vld [vmem:[#allocation3] sm:$0xff]  ;;  %v62_v1 = vld [vmem:[#allocation3 + $0x8] sm:$0xff]  ;;  %s93_s21 = sshll.u32 %s209_s2, 4  ;;  %s182_s23 = smov [#allocation8]   ;;  %s94_s21 = int_to_ptr.hbm [resolvable:$true] %s93_s21 }
   0xd   :  { %v63_v2 = vld [vmem:[#allocation6] sm:$0xff]  ;;  %v64_v3 = vld [vmem:[#allocation6 + $0x8] sm:$0xff] }
   0xe   :  { %v65_v4 = vsub.f32 %v61_v0, %v63_v2  ;;  %v66_v5 = vsub.f32 %v62_v1, %v64_v3 }
  0x10   :  { %v67_v6 = vmul.f32 %v65_v4, %v65_v4  ;;  %v68_v7 = vmul.f32 %v66_v5, %v66_v5 }
  0x12   :  { %v70_v8 = vadd.f32 %v68_v7, %v67_v6 }
  0x14   :  { %77 = vadd.xlane.f32.xlu0 %v70_v8 }
  0x87   :  { %v78_v9 = vpop.xlane.xlu0 %77 }
  0x88   :  { %v79_v10 = vrot.slane %v78_v9, 4 }
  0x8a   :  { %v80_v11 = vadd.f32 %v79_v10, %v78_v9 }
  0x8c   :  { %v81_v12 = vrot.slane %v80_v11, 2 }
  0x8e   :  { %v82_v13 = vadd.f32 %v81_v12, %v80_v11 }
  0x90   :  { %v83_v14 = vrot.slane %v82_v13, 1 }
  0x92   :  { %v84_v15 = vadd.f32 %v83_v14, %v82_v13 }
  0x94   :  { %105 = vpush %v84_v15 }
  0xc5   :  { %s106_s22 = spop %105 }
  0xc6   :  { %87 = sst [smem:[#allocation8]] %s106_s22 }
  0xc7   :  { %96 = dma.smem_to_hbm %s182_s23, 16, %s94_s21, [#allocation5]  }
  0xc8   :  { %176 = dma.done.wait [#allocation5], 16  }
  0xc9   :  { %177 = vsyncadd [#allocation5], 4294967280 }
  0xca   :  { %101 = sfence }
  0xcb   :  { %102 = vsyncpa [#allocation4], 1 }
  0xcc   :  { %103 = vsyncpa [#allocation7], 1 }
  0xcd   :  { %104 = vsyncpa [#allocation5], 1 }

</bundles_post_ra>
